<compile_context>
chip_gen: v5e
topology: v5e:2x2
jax: 0.10.0
libtpu: 0.0.40
codegen_flags: <defaults>
</compile_context>

<pallas_src>
import functools

import jax
import jax.numpy as jnp
from jax.experimental import pallas as pl
from jax.experimental.pallas import tpu as pltpu


def _round_up(n: int, m: int) -> int:
    return ((n + m - 1) // m) * m


def _default_epilogue_dtype():
    """bf16 epilogue only on chips with bf16 VALUs (v6e / v7x)."""
    try:
        kind = jax.devices()[0].device_kind.lower()
    except Exception:  # pragma: no cover - defensive, keeps f32 fallback
        return jnp.float32
    if "v6" in kind or "v7" in kind:
        return jnp.bfloat16
    return jnp.float32


def mlp_kernel(x_ref, w1_ref, b1_ref, w2_ref, b2_ref, o_ref, *, epilogue_dtype):
    # x_ref is the pre-transposed tile: (d_pad, TILE_B), batch on the lane axis.
    # Native [H,K] @ [K,N] MXU matmul with f32 accumulation: (H_pad, TILE_B).
    h = jax.lax.dot_general(
        w1_ref[...], x_ref[...],
        dimension_numbers=(((1,), (0,)), ((), ())),
        preferred_element_type=jnp.float32)
    # Bias + ReLU + w2 multiply in the epilogue dtype (bf16 on v6e/v7x, f32 on v5e).
    h = h.astype(epilogue_dtype)
    h = jnp.maximum(h + b1_ref[...].astype(epilogue_dtype), 0.0)
    # Second linear (out_features == 1): VPU multiply + sublane reduce,
    # accumulated in f32 -- no wasted N=1 MXU matmul.
    prod = (h * w2_ref[...].astype(epilogue_dtype)).astype(jnp.float32)
    y = jnp.sum(prod, axis=0, keepdims=True)               # (1, TILE_B) f32
    y = y + b2_ref[0, 0]                                    # SMEM scalar
    # Lane-dense store: one (1, 1, TILE_B) row per grid step.
    o_ref[...] = jax.nn.sigmoid(y).astype(o_ref.dtype)[None]


def prepare_params(w1, b1, w2, b2, *, matmul_dtype=jnp.bfloat16):
    """One-time weight padding/casting (hoisted out of the per-call path).

    w1: [H, D_in], b1: [H], w2: [1, H], b2: [1]  (PyTorch-native layouts).
    """
    h_dim, d_in = w1.shape
    h_pad = _round_up(h_dim, 128)                       # lane axis of h / epilogue
    d_gran = 16 if matmul_dtype == jnp.bfloat16 else 8  # sublane granularity
    d_pad = _round_up(d_in, d_gran)                     # contraction axis only

    # Padded hidden rows have zero W2 weight -> contribute nothing to the output.
    w1_p = jnp.zeros((h_pad, d_pad), matmul_dtype).at[:h_dim, :d_in].set(
        w1.astype(matmul_dtype))
    b1_p = jnp.zeros((h_pad, 1), jnp.float32).at[:h_dim, 0].set(
        b1.astype(jnp.float32).reshape(-1))
    w2_p = jnp.zeros((h_pad, 1), jnp.float32).at[:h_dim, 0].set(
        w2.astype(jnp.float32).reshape(-1))
    b2_p = b2.astype(jnp.float32).reshape(1, 1)
    return w1_p, b1_p, w2_p, b2_p


@functools.partial(jax.jit, static_argnames=("tile_b", "epilogue_dtype", "out_dtype"))
def neural_net2_forward(x, w1_p, b1_p, w2_p, b2_p, *, tile_b=1024,
                        epilogue_dtype=jnp.float32, out_dtype=None):
    """x: [B, D_in] -> [B, 1].  Weights come pre-padded from prepare_params()."""
    B, d_in = x.shape
    h_pad, d_pad = w1_p.shape
    matmul_dtype = w1_p.dtype
    out_dtype = x.dtype if out_dtype is None else out_dtype

    # Batch tile: multiple of 128 (lane-dense output row + x tile lane axis).
    b_ceil = _round_up(B, 128)
    eff_tile_b = max(128, _round_up(min(tile_b, b_ceil), 128))
    # Ensure >=2 grid steps when the batch allows it, so the "parallel" axis
    # actually splits across both TensorCores on v7x (harmless on v5e/v6e).
    if b_ceil >= 256 and eff_tile_b >= b_ceil:
        eff_tile_b = _round_up(pl.cdiv(b_ceil, 2), 128)
    b_pad = _round_up(B, eff_tile_b)
    num_tiles = b_pad // eff_tile_b

    # Per-call layout plumbing for x only: pad + transpose + cast fused by XLA.
    # Batch lands on the lane axis -> lane-dense VMEM tiles, contiguous DMA rows.
    x_t = jnp.zeros((d_pad, b_pad), matmul_dtype).at[:d_in, :B].set(
        x.astype(matmul_dtype).T)

    in_bytes = jnp.dtype(matmul_dtype).itemsize
    cost = pl.CostEstimate(
        flops=2 * b_pad * d_pad * h_pad + 4 * b_pad * h_pad,
        transcendentals=2 * b_pad,                      # sigmoid ~ exp + recip
        bytes_accessed=(d_pad * b_pad * in_bytes        # x stream
                        + h_pad * d_pad * in_bytes      # W1 (resident)
                        + (2 * h_pad + 1) * 4           # b1, w2, b2
                        + b_pad * jnp.dtype(out_dtype).itemsize))

    out = pl.pallas_call(
        functools.partial(mlp_kernel, epilogue_dtype=epilogue_dtype),
        out_shape=jax.ShapeDtypeStruct((num_tiles, 1, eff_tile_b), out_dtype),
        grid_spec=pltpu.PrefetchScalarGridSpec(
            num_scalar_prefetch=0,
            grid=(num_tiles,),
            in_specs=[
                pl.BlockSpec((d_pad, eff_tile_b), lambda i: (0, i)),  # x^T (streamed)
                pl.BlockSpec((h_pad, d_pad), lambda i: (0, 0)),       # W1 (resident)
                pl.BlockSpec((h_pad, 1), lambda i: (0, 0)),           # b1 (resident)
                pl.BlockSpec((h_pad, 1), lambda i: (0, 0)),           # W2 (resident)
                pl.BlockSpec(memory_space=pltpu.SMEM),                # b2 scalar
            ],
            out_specs=pl.BlockSpec((1, 1, eff_tile_b), lambda i: (i, 0, 0)),
        ),
        compiler_params=pltpu.CompilerParams(
            dimension_semantics=("parallel",),        # megacore split on v7x
            vmem_limit_bytes=32 * 1024 * 1024,        # safe on v5e/v6e/v7x
        ),
        cost_estimate=cost,
    )(x_t, w1_p, b1_p, w2_p, b2_p)

    # (num_tiles, 1, TILE_B) row-major -> (B, 1)
    return out.reshape(b_pad, 1)[:B]


if __name__ == "__main__":
    input_size = 16
    hidden_size = 32
    batch = 8

    key = jax.random.PRNGKey(0)
    kx, k1, k2, k3, k4 = jax.random.split(key, 5)
    x = jax.random.normal(kx, (batch, input_size), jnp.float32)

    # Deterministic init mimicking PyTorch nn.Linear default U(-1/sqrt(fan_in), ...),
    # stored in the PyTorch-native layouts.
    bound1 = 1.0 / (input_size ** 0.5)
    bound2 = 1.0 / (hidden_size ** 0.5)
    w1 = jax.random.uniform(k1, (hidden_size, input_size), jnp.float32,
                            minval=-bound1, maxval=bound1)
    b1 = jax.random.uniform(k2, (hidden_size,), jnp.float32,
                            minval=-bound1, maxval=bound1)
    w2 = jax.random.uniform(k3, (1, hidden_size), jnp.float32,
                            minval=-bound2, maxval=bound2)
    b2 = jax.random.uniform(k4, (1,), jnp.float32,
                            minval=-bound2, maxval=bound2)

    # One-time weight prep (padding/casting hoisted out of the per-call path).
    params = prepare_params(w1, b1, w2, b2)
    epilogue_dtype = _default_epilogue_dtype()

    out = neural_net2_forward(x, *params, epilogue_dtype=epilogue_dtype)
    out = jax.block_until_ready(out)

    # Reference 1: pure JAX with the same bf16 matmul operands as the kernel
    # (f32 bias/ReLU) -- covers the bf16 epilogue on v6e/v7x within 1e-2.
    xb = x.astype(jnp.bfloat16)
    w1b = w1.astype(jnp.bfloat16)
    h_ref = jnp.maximum(
        jax.lax.dot_general(xb, w1b, (((1,), (1,)), ((), ())),
                            preferred_element_type=jnp.float32) + b1[None, :],
        0.0)
    ref_bf16 = jax.nn.sigmoid(h_ref @ w2.T + b2[None, :])

    # Reference 2: full-f32 PyTorch-equivalent forward -- loose tolerance
    # (covers the bf16 cast of the matmul inputs + epilogue).
    ref_f32 = jax.nn.sigmoid(
        jnp.maximum(x @ w1.T + b1[None, :], 0.0) @ w2.T + b2[None, :])

    assert out.shape == (batch, 1)
    assert jnp.allclose(out, ref_bf16, atol=1e-2, rtol=1e-2)
    assert jnp.allclose(out, ref_f32, atol=2e-2, rtol=2e-2)

    print("KERNEL_OK")
</pallas_src>

<mosaic_0001>
module attributes {stable_mosaic.version = 11 : i64} {
  func.func @mlp_kernel(%arg0: i32, %arg1: memref<16x128xbf16, #tpu.memory_space<vmem>>, %arg2: memref<128x16xbf16, #tpu.memory_space<vmem>>, %arg3: memref<128x1xf32, #tpu.memory_space<vmem>>, %arg4: memref<128x1xf32, #tpu.memory_space<vmem>>, %arg5: memref<1x1xf32, #tpu.memory_space<smem>>, %arg6: memref<1x1x128xf32, #tpu.memory_space<vmem>>) attributes {dimension_semantics = [#tpu.dimension_semantics<parallel>], iteration_bounds = array<i64: 1>, scalar_prefetch = 0 : i64, scratch_operands = 0 : i64, tpu.core_type = #tpu.core_type<tc>, window_params = [{transform_indices = @transform_0, window_bounds = array<i64: 16, 128>}, {pipeline_mode = #tpu.pipeline_mode<synchronous>, transform_indices = @transform_1, window_bounds = array<i64: 128, 16>}, {pipeline_mode = #tpu.pipeline_mode<synchronous>, transform_indices = @transform_2, window_bounds = array<i64: 128, 1>}, {pipeline_mode = #tpu.pipeline_mode<synchronous>, transform_indices = @transform_3, window_bounds = array<i64: 128, 1>}, {transform_indices = @transform_4, window_bounds = array<i64: 1, 1>}, {transform_indices = @transform_5, window_bounds = array<i64: 1, 1, 128>}]} {
    %c0 = arith.constant 0 : index
    %c0_0 = arith.constant 0 : index
    %0 = vector.load %arg2[%c0, %c0_0] : memref<128x16xbf16, #tpu.memory_space<vmem>>, vector<128x16xbf16>
    %c0_1 = arith.constant 0 : index
    %c0_2 = arith.constant 0 : index
    %1 = vector.load %arg1[%c0_1, %c0_2] : memref<16x128xbf16, #tpu.memory_space<vmem>>, vector<16x128xbf16>
    %cst = arith.constant dense<0.000000e+00> : vector<128x128xf32>
    %2 = tpu.matmul %0, %1, %cst {dimension_numbers = #tpu.dot_dimension_numbers<[1], [0], [0], [1], [0, 0, 1, 1], [], []>} : vector<128x16xbf16>, vector<16x128xbf16>, vector<128x128xf32> -> vector<128x128xf32>
    %c0_3 = arith.constant 0 : index
    %c0_4 = arith.constant 0 : index
    %3 = vector.load %arg3[%c0_3, %c0_4] : memref<128x1xf32, #tpu.memory_space<vmem>>, vector<128x1xf32>
    %4 = vector.broadcast %3 : vector<128x1xf32> to vector<128x128xf32>
    %5 = arith.addf %2, %4 : vector<128x128xf32>
    %cst_5 = arith.constant 0.000000e+00 : f32
    %6 = vector.broadcast %cst_5 : f32 to vector<128x128xf32>
    %7 = arith.maximumf %5, %6 : vector<128x128xf32>
    %c0_6 = arith.constant 0 : index
    %c0_7 = arith.constant 0 : index
    %8 = vector.load %arg4[%c0_6, %c0_7] : memref<128x1xf32, #tpu.memory_space<vmem>>, vector<128x1xf32>
    %9 = vector.broadcast %8 : vector<128x1xf32> to vector<128x128xf32>
    %10 = arith.mulf %7, %9 : vector<128x128xf32>
    %cst_8 = arith.constant dense<0.000000e+00> : vector<128xf32>
    %11 = vector.multi_reduction <add>, %10, %cst_8 [0] : vector<128x128xf32> to vector<128xf32>
    %12 = vector.shape_cast %11 : vector<128xf32> to vector<1x128xf32>
    %c0_9 = arith.constant 0 : index
    %c0_10 = arith.constant 0 : index
    %13 = memref.load %arg5[%c0_9, %c0_10] : memref<1x1xf32, #tpu.memory_space<smem>>
    %14 = vector.broadcast %13 : f32 to vector<1x128xf32>
    %15 = arith.addf %12, %14 : vector<1x128xf32>
    %16 = arith.negf %15 : vector<1x128xf32>
    %17 = math.exp %16 : vector<1x128xf32>
    %cst_11 = arith.constant 1.000000e+00 : f32
    %18 = vector.broadcast %cst_11 : f32 to vector<1x128xf32>
    %19 = arith.addf %18, %17 : vector<1x128xf32>
    %20 = arith.divf %18, %19 : vector<1x128xf32>
    %21 = vector.shape_cast %20 : vector<1x128xf32> to vector<1x1x128xf32>
    %c0_12 = arith.constant 0 : index
    %c0_13 = arith.constant 0 : index
    %c0_14 = arith.constant 0 : index
    %22 = vector.load %arg6[%c0_12, %c0_13, %c0_14] : memref<1x1x128xf32, #tpu.memory_space<vmem>>, vector<1x1x128xf32>
    tpu.vector_store %arg6[%c0_12, %c0_13, %c0_14], %21 {strides = array<i32>} : memref<1x1x128xf32, #tpu.memory_space<vmem>>, vector<1x1x128xf32>,
    return
  }
  func.func @transform_0(%arg0: i32) -> (i32, i32) {
    %c0_i32 = arith.constant 0 : i32
    %c0_i32_0 = arith.constant 0 : i32
    return %c0_i32, %arg0 : i32, i32
  }
  func.func @transform_1(%arg0: i32) -> (i32, i32) {
    %c0_i32 = arith.constant 0 : i32
    %c0_i32_0 = arith.constant 0 : i32
    %c0_i32_1 = arith.constant 0 : i32
    return %c0_i32, %c0_i32_0 : i32, i32
  }
  func.func @transform_2(%arg0: i32) -> (i32, i32) {
    %c0_i32 = arith.constant 0 : i32
    %c0_i32_0 = arith.constant 0 : i32
    %c0_i32_1 = arith.constant 0 : i32
    return %c0_i32, %c0_i32_0 : i32, i32
  }
  func.func @transform_3(%arg0: i32) -> (i32, i32) {
    %c0_i32 = arith.constant 0 : i32
    %c0_i32_0 = arith.constant 0 : i32
    %c0_i32_1 = arith.constant 0 : i32
    return %c0_i32, %c0_i32_0 : i32, i32
  }
  func.func @transform_4(%arg0: i32) -> (i32, i32) {
    %c0_i32 = arith.constant 0 : i32
    %c0_i32_0 = arith.constant 0 : i32
    %c0_i32_1 = arith.constant 0 : i32
    return %c0_i32, %c0_i32_0 : i32, i32
  }
  func.func @transform_5(%arg0: i32) -> (i32, i32, i32) {
    %c0_i32 = arith.constant 0 : i32
    %c0_i32_0 = arith.constant 0 : i32
    %c0_i32_1 = arith.constant 0 : i32
    return %arg0, %c0_i32, %c0_i32_0 : i32, i32, i32
  }
}

</mosaic_0001>

<bundles_post_ra>
// kernel: neural_net2_forward.1
= control target key start
LH: loop header
LB: loop body
LE: loop exit
PB: predicated region body
PF: predicated region fallthrough
CT: control target
= control target key end

     0   :  { %v497_v0 = vmov 0   ;;  %vm182_vm0 = vcmask 130048   ;;  %s671_s2 = inlined_call_operand.vmem [shape: f32[128,1], index: 2, kind: input, shape index: {}]   ;;  %s672_s0 = inlined_call_operand.vmem [shape: bf16[16,128], index: 0, kind: input, shape index: {}]   ;;  %s673_s1 = inlined_call_operand.vmem [shape: bf16[128,16], index: 1, kind: input, shape index: {}]   ;;  %s674_s3 = inlined_call_operand.vmem [shape: f32[128,1], index: 3, kind: input, shape index: {}]   ;;  %s675_s4 = inlined_call_operand.<no memory space> [shape: f32[1,1], index: 4, kind: input, shape index: {}]   ;;  %s676_s5 = inlined_call_operand.vmem [shape: f32[1,1,128], index: 5, kind: output, shape index: {}]  }
   0x1   :  { %492 = vset.pattern.permute.xlu2 %v497_v0  ;;  %491 = vset.pattern.permute.xlu1 %v497_v0  ;;  %v44_v1 = vld [vmem:[%s671_s2 + $0x20] sm:$0xff]  ;;  %v42_v2 = vld [vmem:[%s671_s2 + $0x10] sm:$0xff]  ;;  %v45_v9 = vld [vmem:[%s671_s2 + $0x28] sm:$0xff] }
   0x2   :  { %v40_v3 = vld [vmem:[%s671_s2] sm:$0xff]  ;;  %490 = vset.pattern.permute.xlu0 %v497_v0  ;;  %78 = vperm.xlu2 %492, %v44_v1   ;;  %v479_v6 = vld [vmem:[%s673_s1 + $0x10] sm:$0xff]  ;;  %v43_v10 = vld [vmem:[%s671_s2 + $0x18] sm:$0xff] }
   0x3   :  { %v485_v4 = vld [vmem:[%s672_s0] sm:$0xff]  ;;  %68 = vperm.xlu1 %491, %v42_v2   ;;  %58 = vperm.xlu0 %490, %v40_v3   ;;  %v483_v8 = vld [vmem:[%s673_s1 + $0x30] sm:$0xff]  ;;  %v41_v11 = vld [vmem:[%s671_s2 + $0x8] sm:$0xff] }
   0x4   :  { %v477_v5 = vld [vmem:[%s673_s1] sm:$0xff]  ;;  %214 = vmatpush.bf16.msra.mxu0 %v485_v4  ;;  %486 = vmatpush.bf16.msra.mxu1 %v485_v4  ;;  %v47_v13 = vld [vmem:[%s671_s2 + $0x38] sm:$0xff]  ;;  %v46_v14 = vld [vmem:[%s671_s2 + $0x30] sm:$0xff] }
   0x5   :  { %v481_v7 = vld [vmem:[%s673_s1 + $0x20] sm:$0xff]  ;;  %487 = vmatpush.bf16.msra.mxu2 %v485_v4  ;;  %488 = vmatpush.bf16.msra.mxu3 %v485_v4  ;;  %v478_v15 = vld [vmem:[%s673_s1 + $0x8] sm:$0xff]  ;;  %v480_v16 = vld [vmem:[%s673_s1 + $0x18] sm:$0xff] }
   0x6   :  { %v48_v12 = vld [vmem:[%s671_s2 + $0x40] sm:$0xff]  ;;  %v482_v17 = vld [vmem:[%s673_s1 + $0x28] sm:$0xff]  ;;  %v484_v18 = vld [vmem:[%s673_s1 + $0x38] sm:$0xff] }
   0x7   :  { %468 = vmatmul.msk.bf16.vlgmr.msra.gmra.mxu0 %vm182_vm0, %v477_v5  ;;  %470 = vmatmul.msk.bf16.vlgmr.msra.gmra.mxu1 %vm182_vm0, %v479_v6  ;;  %v51_v19 = vld [vmem:[%s671_s2 + $0x58] sm:$0xff]  ;;  %v50_v20 = vld [vmem:[%s671_s2 + $0x50] sm:$0xff]  ;;  %v49_v21 = vld [vmem:[%s671_s2 + $0x48] sm:$0xff] }
   0x8   :  { %472 = vmatmul.msk.bf16.vlgmr.msra.gmra.mxu2 %vm182_vm0, %v481_v7  ;;  %474 = vmatmul.msk.bf16.vlgmr.msra.gmra.mxu3 %vm182_vm0, %v483_v8  ;;  %v272_v22 = vld [vmem:[%s674_s3] sm:$0xff]  ;;  %v53_v23 = vld [vmem:[%s671_s2 + $0x68] sm:$0xff]  ;;  %v275_v25 = vld [vmem:[%s674_s3 + $0x18] sm:$0xff] }
   0x9   :  { %v52_v24 = vld [vmem:[%s671_s2 + $0x60] sm:$0xff]  ;;  %v274_v26 = vld [vmem:[%s674_s3 + $0x10] sm:$0xff]  ;;  %v273_v27 = vld [vmem:[%s674_s3 + $0x8] sm:$0xff] }
   0xa   :  { %83 = vperm.xlu2 %492, %v45_v9   ;;  %v278_v28 = vld [vmem:[%s674_s3 + $0x30] sm:$0xff]  ;;  %v277_v29 = vld [vmem:[%s674_s3 + $0x28] sm:$0xff]  ;;  %v276_v30 = vld [vmem:[%s674_s3 + $0x20] sm:$0xff] }
   0xb   :  { %73 = vperm.xlu1 %491, %v43_v10   ;;  %63 = vperm.xlu0 %490, %v41_v11   ;;  %v281_v31 = vld [vmem:[%s674_s3 + $0x48] sm:$0xff]  ;;  %v280_v32 = vld [vmem:[%s674_s3 + $0x40] sm:$0xff]  ;;  %v279_v33 = vld [vmem:[%s674_s3 + $0x38] sm:$0xff] }
   0xc   :  { %v54_v34 = vld [vmem:[%s671_s2 + $0x70] sm:$0xff]  ;;  %v283_v35 = vld [vmem:[%s674_s3 + $0x58] sm:$0xff]  ;;  %v285_v37 = vld [vmem:[%s674_s3 + $0x68] sm:$0xff] }
   0xd   :  { %v282_v36 = vld [vmem:[%s674_s3 + $0x50] sm:$0xff]  ;;  %v55_v38 = vld [vmem:[%s671_s2 + $0x78] sm:$0xff]  ;;  %v284_v39 = vld [vmem:[%s674_s3 + $0x60] sm:$0xff] }
   0xe   :  { %v287_v40 = vld [vmem:[%s674_s3 + $0x78] sm:$0xff]  ;;  %v286_v41 = vld [vmem:[%s674_s3 + $0x70] sm:$0xff] }
  0x12   :  { %98 = vperm.xlu2 %492, %v48_v12  }
  0x13   :  { %93 = vperm.xlu1 %491, %v47_v13   ;;  %88 = vperm.xlu0 %490, %v46_v14  }
  0x17   :  { %469 = vmatmul.msk.bf16.gmra.mxu0 %vm182_vm0, %v478_v15  ;;  %471 = vmatmul.msk.bf16.gmra.mxu1 %vm182_vm0, %v480_v16 }
  0x18   :  { %473 = vmatmul.msk.bf16.gmra.mxu2 %vm182_vm0, %v482_v17  ;;  %475 = vmatmul.msk.bf16.gmra.mxu3 %vm182_vm0, %v484_v18 }
  0x1a   :  { %113 = vperm.xlu2 %492, %v51_v19  }
  0x1b   :  { %108 = vperm.xlu1 %491, %v50_v20   ;;  %103 = vperm.xlu0 %490, %v49_v21  }
  0x22   :  { %290 = vperm.xlu2 %492, %v272_v22  }
  0x23   :  { %123 = vperm.xlu1 %491, %v53_v23   ;;  %118 = vperm.xlu0 %490, %v52_v24  }
  0x2a   :  { %305 = vperm.xlu2 %492, %v275_v25  }
  0x2b   :  { %300 = vperm.xlu1 %491, %v274_v26   ;;  %295 = vperm.xlu0 %490, %v273_v27  }
  0x32   :  { %320 = vperm.xlu2 %492, %v278_v28  }
  0x33   :  { %315 = vperm.xlu1 %491, %v277_v29   ;;  %310 = vperm.xlu0 %490, %v276_v30  }
  0x3a   :  { %335 = vperm.xlu2 %492, %v281_v31  }
  0x3b   :  { %330 = vperm.xlu1 %491, %v280_v32   ;;  %325 = vperm.xlu0 %490, %v279_v33  }
  0x42   :  { %128 = vperm.xlu2 %492, %v54_v34  }
  0x43   :  { %345 = vperm.xlu1 %491, %v283_v35   ;;  %340 = vperm.xlu0 %490, %v282_v36  }
  0x4a   :  { %355 = vperm.xlu2 %492, %v285_v37  }
  0x4b   :  { %133 = vperm.xlu1 %491, %v55_v38   ;;  %350 = vperm.xlu0 %490, %v284_v39  }
  0x53   :  { %365 = vperm.xlu1 %491, %v287_v40   ;;  %360 = vperm.xlu0 %490, %v286_v41  }
  0x5c   :  { %v79_v42 = vpop.permute.xlu2 %78 }
  0x64   :  { %v84_v43 = vpop.permute.xlu2 %83 }
  0x6c   :  { %v99_v46 = vpop.permute.xlu2 %98 }
  0x74   :  { %v659_v49 = vpop.permute.xlu2 %113 }
  0x75   :  { %v69_v44 = vpop.permute.xlu1 %68  ;;  %v59_v45 = vpop.permute.xlu0 %58 }
  0x7c   :  { %v291_v57 = vpop.permute.xlu2 %290 }
  0x7d   :  { %v74_v47 = vpop.permute.xlu1 %73  ;;  %v64_v48 = vpop.permute.xlu0 %63 }
  0x84   :  { %v216_v50 = vpop.f32.mrf.mxu0  ;;  %v226_v53 = vpop.f32.mrf.mxu1 }
  0x85   :  { %v94_v51 = vpop.permute.xlu1 %93  ;;  %v89_v52 = vpop.permute.xlu0 %88  ;;  %v217_v62 = vadd.f32 %v216_v50, %v59_v45  ;;  %v227_v14 = vadd.f32 %v226_v53, %v79_v42 }
  0x86   :  { %v306_v0 = vpop.permute.xlu2 %305 }
  0x87   :  { %v256_v2 = vmax.f32 %v217_v62, 0.0  ;;  %v260_v21 = vmax.f32 %v227_v14, 0.0 }
  0x89   :  { %v368_v10 = vmul.f32 %v291_v57, %v256_v2 }
  0x8b   :  { %v236_v63 = vpop.f32.mrf.mxu2  ;;  %v246_v23 = vpop.f32.mrf.mxu3 }
  0x8c   :  { %v218_v54 = vpop.f32.mrf.mxu0  ;;  %v228_v58 = vpop.f32.mrf.mxu1  ;;  %v237_v41 = vadd.f32 %v236_v63, %v99_v46 }
  0x8d   :  { %v109_v55 = vpop.permute.xlu1 %108  ;;  %v104_v56 = vpop.permute.xlu0 %103  ;;  %v219_v1 = vadd.f32 %v218_v54, %v64_v48  ;;  %v229_v22 = vadd.f32 %v228_v58, %v84_v43 }
  0x8e   :  { %v321_v18 = vpop.permute.xlu2 %320  ;;  %v264_v48 = vmax.f32 %v237_v41, 0.0 }
  0x8f   :  { %v257_v5 = vmax.f32 %v219_v1, 0.0  ;;  %v261_v30 = vmax.f32 %v229_v22, 0.0 }
  0x93   :  { %v238_v15 = vpop.f32.mrf.mxu2 }
  0x94   :  { %v221_v59 = vpop.f32.mrf.mxu0  ;;  %v231_v4 = vpop.f32.mrf.mxu1  ;;  %v239_v45 = vadd.f32 %v238_v15, %v104_v56 }
  0x95   :  { %v661_v60 = vpop.permute.xlu1 %123  ;;  %v119_v61 = vpop.permute.xlu0 %118  ;;  %v222_v3 = vadd.f32 %v221_v59, %v69_v44  ;;  %v232_v27 = vadd.f32 %v231_v4, %v89_v52 }
  0x96   :  { %v336_v36 = vpop.permute.xlu2 %335  ;;  %v248_v44 = vpop.f32.mrf.mxu3  ;;  %v265_v53 = vmax.f32 %v239_v45, 0.0  ;;  %v247_v2 = vadd.f32 %v246_v23, %v119_v61 }
  0x97   :  { %v258_v11 = vmax.f32 %v222_v3, 0.0  ;;  %v262_v33 = vmax.f32 %v232_v27, 0.0 }
  0x98   :  { %v377_v1 = vmul.f32 %v336_v36, %v265_v53  ;;  %v268_v56 = vmax.f32 %v247_v2, 0.0 }
  0x99   :  { %v374_v42 = vmul.f32 %v321_v18, %v262_v33 }
  0x9b   :  { %v241_v34 = vpop.f32.mrf.mxu2 }
  0x9c   :  { %v223_v6 = vpop.f32.mrf.mxu0  ;;  %v233_v24 = vpop.f32.mrf.mxu1  ;;  %v242_v50 = vadd.f32 %v241_v34, %v109_v55 }
  0x9d   :  { %v301_v7 = vpop.permute.xlu1 %300  ;;  %v296_v8 = vpop.permute.xlu0 %295  ;;  %v224_v9 = vadd.f32 %v223_v6, %v74_v47  ;;  %v234_v31 = vadd.f32 %v233_v24, %v94_v51 }
  0x9e   :  { %v369_v12 = vmul.f32 %v296_v8, %v257_v5  ;;  %v370_v16 = vmul.f32 %v301_v7, %v258_v11  ;;  %v266_v59 = vmax.f32 %v242_v50, 0.0  ;;  %v251_v3 = vpop.f32.mrf.mxu3  ;;  %v249_v8 = vadd.f32 %v248_v44, %v661_v60 }
  0x9f   :  { %v259_v13 = vmax.f32 %v224_v9, 0.0  ;;  %v263_v37 = vmax.f32 %v234_v31, 0.0 }
  0xa0   :  { %v384_v17 = vadd.f32 %v369_v12, %v368_v10  ;;  %v269_v15 = vmax.f32 %v249_v8, 0.0 }
  0xa1   :  { %v371_v20 = vmul.f32 %v306_v0, %v259_v13  ;;  %v129_v0 = vpop.permute.xlu2 %128 }
  0xa2   :  { %v385_v19 = vadd.f32 %v384_v17, %v370_v16  ;;  %v252_v11 = vadd.f32 %v251_v3, %v129_v0 }
  0xa3   :  { %v243_v51 = vpop.f32.mrf.mxu2 }
  0xa4   :  { %v386_v29 = vadd.f32 %v385_v19, %v371_v20  ;;  %v244_v46 = vadd.f32 %v243_v51, %v659_v49  ;;  %v270_v49 = vmax.f32 %v252_v11, 0.0 }
  0xa5   :  { %v316_v25 = vpop.permute.xlu1 %315  ;;  %v311_v26 = vpop.permute.xlu0 %310 }
  0xa6   :  { %v372_v28 = vmul.f32 %v311_v26, %v260_v21  ;;  %v373_v35 = vmul.f32 %v316_v25, %v261_v30  ;;  %v267_v5 = vmax.f32 %v244_v46, 0.0  ;;  %v253_v14 = vpop.f32.mrf.mxu3  ;;  %v406_v30 = vstv %s675_s4 }
  0xa8   :  { %v387_v32 = vadd.f32 %v386_v29, %v372_v28 }
  0xa9   :  { %v356_v13 = vpop.permute.xlu2 %355 }
  0xaa   :  { %v388_v38 = vadd.f32 %v387_v32, %v373_v35  ;;  %v381_v17 = vmul.f32 %v356_v13, %v269_v15 }
  0xac   :  { %v389_v47 = vadd.f32 %v388_v38, %v374_v42 }
  0xad   :  { %v331_v39 = vpop.permute.xlu1 %330  ;;  %v326_v40 = vpop.permute.xlu0 %325 }
  0xae   :  { %v375_v43 = vmul.f32 %v326_v40, %v263_v37  ;;  %v376_v54 = vmul.f32 %v331_v39, %v264_v48 }
  0xb0   :  { %v390_v52 = vadd.f32 %v389_v47, %v375_v43 }
  0xb2   :  { %v391_v62 = vadd.f32 %v390_v52, %v376_v54 }
  0xb4   :  { %v392_v4 = vadd.f32 %v391_v62, %v377_v1 }
  0xb5   :  { %v346_v57 = vpop.permute.xlu1 %345  ;;  %v341_v58 = vpop.permute.xlu0 %340 }
  0xb6   :  { %v378_v63 = vmul.f32 %v341_v58, %v266_v59  ;;  %v379_v9 = vmul.f32 %v346_v57, %v267_v5 }
  0xb8   :  { %v393_v6 = vadd.f32 %v392_v4, %v378_v63 }
  0xba   :  { %v394_v12 = vadd.f32 %v393_v6, %v379_v9 }
  0xbd   :  { %v134_v55 = vpop.permute.xlu1 %133  ;;  %v351_v7 = vpop.permute.xlu0 %350 }
  0xbe   :  { %v380_v10 = vmul.f32 %v351_v7, %v268_v56  ;;  %v254_v61 = vadd.f32 %v253_v14, %v134_v55 }
  0xc0   :  { %v395_v16 = vadd.f32 %v394_v12, %v380_v10  ;;  %v271_v20 = vmax.f32 %v254_v61, 0.0 }
  0xc2   :  { %v396_v22 = vadd.f32 %v395_v16, %v381_v17 }
  0xc5   :  { %v366_v18 = vpop.permute.xlu1 %365  ;;  %v361_v19 = vpop.permute.xlu0 %360 }
  0xc6   :  { %v382_v21 = vmul.f32 %v361_v19, %v270_v49  ;;  %v383_v23 = vmul.f32 %v366_v18, %v271_v20 }
  0xc8   :  { %v397_v24 = vadd.f32 %v396_v22, %v382_v21 }
  0xca   :  { %v398_v25 = vadd.f32 %v397_v24, %v383_v23 }
  0xcc   :  { %v399_v60 = vrot.slane %v398_v25, 4 }
  0xce   :  { %v400_v26 = vadd.f32 %v399_v60, %v398_v25 }
  0xd0   :  { %v401_v27 = vrot.slane %v400_v26, 2 }
  0xd2   :  { %v402_v28 = vadd.f32 %v401_v27, %v400_v26 }
  0xd4   :  { %v403_v29 = vrot.slane %v402_v28, 1 }
  0xd6   :  { %v404_v31 = vadd.f32 %v403_v29, %v402_v28 }
  0xd8   :  { %v407_v32 = vadd.f32 %v406_v30, %v404_v31 }
  0xda   :  { %v476_v33 = vmul.f32 -1.442695, %v407_v32 }
  0xdc   :  { %493 = vpow2.f32 %v476_v33 }
  0xe2   :  { %v494_v34 = vpop.eup %493 }
  0xe3   :  { %v411_v35 = vadd.f32 1.0, %v494_v34 }
  0xe5   :  { %495 = vrcp.f32 %v411_v35  ;;  %v423_v39 = vand.u32 2147483648, %v411_v35  ;;  %v421_v41 = vand.u32 2147483647, %v411_v35  ;;  %vm417_vm2 = vweird.f32 %v411_v35 }
  0xe7   :  { %v424_v43 = vor.u32 1.1754944e-38, %v423_v39  ;;  %vm422_vm4 = vcmp.eq.f32.partialorder %v421_v41, 8.507059e+37 }
  0xeb   :  { %v496_v36 = vpop.eup %495 }
  0xec   :  { %v413_v37 = vmul.f32 %v496_v36, %v411_v35  ;;  %vm418_vm1 = vweird.f32 %v496_v36 }
  0xed   :  { %vm419_vm3 = vmor %vm417_vm2, %vm418_vm1 }
  0xee   :  { %v414_v38 = vsub.f32 1.0, %v413_v37 }
  0xf0   :  { %v415_v40 = vmul.f32 %v496_v36, %v414_v38 }
  0xf2   :  { %v416_v42 = vadd.f32 %v496_v36, %v415_v40 }
  0xf4   :  { %v420_v44 = vsel %vm419_vm3, %v496_v36, %v416_v42 }
  0xf5   :  { %v425_v45 = vsel %vm422_vm4, %v424_v43, %v420_v44 }
  0xf6   :  { %427 = vst [vmem:[%s676_s5] sm:$0x1] %v425_v45 }

</bundles_post_ra>
